<compile_context>
chip_gen: v5e
topology: v5e:2x2
jax: 0.10.0
libtpu: 0.0.40
codegen_flags: <defaults>
</compile_context>

<pallas_src>
import jax
import jax.numpy as jnp
from jax.experimental import pallas as pl
from jax.experimental.pallas import tpu as pltpu

_LANE = 128     # lane width (last dim)
_SUBLANE = 8    # sublane width (second-to-last dim)


def _round_up(n, m):
    return ((n + m - 1) // m) * m


def actor_kernel(s_ref, w1_ref, b1_ref, w2_ref, b2_ref, out_ref):
    # Layer 1: dense + ReLU (MXU matmul, f32 accumulate, VPU max)
    h = jnp.dot(s_ref[...], w1_ref[...], preferred_element_type=jnp.float32)
    h = jnp.maximum(h + b1_ref[...], 0.0)
    # Layer 2: dense + tanh (MXU matmul, EUP tanh)
    a = jnp.dot(h, w2_ref[...], preferred_element_type=jnp.float32)
    out_ref[...] = jnp.tanh(a + b2_ref[...]).astype(out_ref.dtype)


def actor_forward(s, w1, b1, w2, b2):
    """Forward pass of the DDPG actor.

    Args (PyTorch Linear layouts):
      s : (B, s_space) f32
      w1: (hidden, s_space) f32, b1: (hidden,) f32
      w2: (a_space, hidden) f32, b2: (a_space,) f32
    Returns:
      (B, a_space) f32 = tanh(relu(s @ w1.T + b1) @ w2.T + b2)
    """
    B, s_space = s.shape
    hidden = w1.shape[0]
    a_space = w2.shape[0]

    # Pad every dim to clean TPU tile boundaries (lane-dense loads/stores).
    Bp = _round_up(B, _SUBLANE)
    Sp = _round_up(s_space, _LANE)
    Hp = _round_up(hidden, _LANE)
    Ap = _round_up(a_space, _LANE)

    s_p = jnp.pad(s, ((0, Bp - B), (0, Sp - s_space)))
    w1_p = jnp.pad(w1.T, ((0, Sp - s_space), (0, Hp - hidden)))   # (Sp, Hp)
    b1_p = jnp.pad(b1[None, :], ((0, 0), (0, Hp - hidden)))       # (1, Hp)
    w2_p = jnp.pad(w2.T, ((0, Hp - hidden), (0, Ap - a_space)))   # (Hp, Ap)
    b2_p = jnp.pad(b2[None, :], ((0, 0), (0, Ap - a_space)))      # (1, Ap)

    # Single invocation, no grid: everything resides in VMEM, Mosaic picks the
    # natural layouts, and there is no pipeline prologue/epilogue overhead.
    # TODO(synk): if batch ever grows into the thousands, tile only the batch
    # axis (grid=(cdiv(B, TB),), weights pinned with index_map (0,0), batch
    # axis "parallel" for v7x's two TensorCores).
    out_p = pl.pallas_call(
        actor_kernel,
        out_shape=jax.ShapeDtypeStruct((Bp, Ap), jnp.float32),
        in_specs=[pl.BlockSpec(memory_space=pltpu.MemorySpace.VMEM)] * 5,
        out_specs=pl.BlockSpec(memory_space=pltpu.MemorySpace.VMEM),
    )(s_p, w1_p, b1_p, w2_p, b2_p)

    return out_p[:B, :a_space]


def reference_forward(s, w1, b1, w2, b2):
    """Pure-JAX reference matching PyTorch Linear semantics (W is (out, in))."""
    h = jnp.maximum(s @ w1.T + b1, 0.0)
    return jnp.tanh(h @ w2.T + b2)


if __name__ == "__main__":
    # Small shapes consistent with the module: state dim 16, hidden fixed at 50,
    # action dim 4.
    batch = 8
    s_space = 16
    hidden = 50
    a_space = 4

    key = jax.random.PRNGKey(0)
    k_s, k_w1, k_b1, k_w2, k_b2 = jax.random.split(key, 5)

    s = jax.random.normal(k_s, (batch, s_space), dtype=jnp.float32)

    # PyTorch Linear parameter shapes: W (out, in), b (out,)
    w1 = jax.random.normal(k_w1, (hidden, s_space), dtype=jnp.float32) * 0.1
    b1 = jax.random.normal(k_b1, (hidden,), dtype=jnp.float32) * 0.1
    w2 = jax.random.normal(k_w2, (a_space, hidden), dtype=jnp.float32) * 0.1
    b2 = jax.random.normal(k_b2, (a_space,), dtype=jnp.float32) * 0.1

    out = actor_forward(s, w1, b1, w2, b2)
    out = jax.block_until_ready(out)

    ref = reference_forward(s, w1, b1, w2, b2)
    assert out.shape == (batch, a_space)
    assert jnp.allclose(out, ref, atol=1e-5, rtol=1e-5), "mismatch vs reference"

    print("KERNEL_OK")
</pallas_src>

<mosaic_0001>
module attributes {stable_mosaic.version = 11 : i64} {
  func.func @actor_kernel(%arg0: memref<8x128xf32, #tpu.memory_space<vmem>>, %arg1: memref<128x128xf32, #tpu.memory_space<vmem>>, %arg2: memref<1x128xf32, #tpu.memory_space<vmem>>, %arg3: memref<128x128xf32, #tpu.memory_space<vmem>>, %arg4: memref<1x128xf32, #tpu.memory_space<vmem>>, %arg5: memref<8x128xf32, #tpu.memory_space<vmem>>) attributes {dimension_semantics = [], scalar_prefetch = 0 : i64, scratch_operands = 0 : i64, tpu.core_type = #tpu.core_type<tc>} {
    %c0 = arith.constant 0 : index
    %c0_0 = arith.constant 0 : index
    %0 = vector.load %arg0[%c0, %c0_0] : memref<8x128xf32, #tpu.memory_space<vmem>>, vector<8x128xf32>
    %c0_1 = arith.constant 0 : index
    %c0_2 = arith.constant 0 : index
    %1 = vector.load %arg1[%c0_1, %c0_2] : memref<128x128xf32, #tpu.memory_space<vmem>>, vector<128x128xf32>
    %cst = arith.constant dense<0.000000e+00> : vector<8x128xf32>
    %2 = tpu.matmul %0, %1, %cst {dimension_numbers = #tpu.dot_dimension_numbers<[1], [0], [0], [1], [0, 0, 1, 1], [], []>} : vector<8x128xf32>, vector<128x128xf32>, vector<8x128xf32> -> vector<8x128xf32>
    %c0_3 = arith.constant 0 : index
    %c0_4 = arith.constant 0 : index
    %3 = vector.load %arg2[%c0_3, %c0_4] : memref<1x128xf32, #tpu.memory_space<vmem>>, vector<1x128xf32>
    %4 = vector.broadcast %3 : vector<1x128xf32> to vector<8x128xf32>
    %5 = arith.addf %2, %4 : vector<8x128xf32>
    %cst_5 = arith.constant 0.000000e+00 : f32
    %6 = vector.broadcast %cst_5 : f32 to vector<8x128xf32>
    %7 = arith.maximumf %5, %6 : vector<8x128xf32>
    %c0_6 = arith.constant 0 : index
    %c0_7 = arith.constant 0 : index
    %8 = vector.load %arg3[%c0_6, %c0_7] : memref<128x128xf32, #tpu.memory_space<vmem>>, vector<128x128xf32>
    %cst_8 = arith.constant dense<0.000000e+00> : vector<8x128xf32>
    %9 = tpu.matmul %7, %8, %cst_8 {dimension_numbers = #tpu.dot_dimension_numbers<[1], [0], [0], [1], [0, 0, 1, 1], [], []>} : vector<8x128xf32>, vector<128x128xf32>, vector<8x128xf32> -> vector<8x128xf32>
    %c0_9 = arith.constant 0 : index
    %c0_10 = arith.constant 0 : index
    %10 = vector.load %arg4[%c0_9, %c0_10] : memref<1x128xf32, #tpu.memory_space<vmem>>, vector<1x128xf32>
    %11 = vector.broadcast %10 : vector<1x128xf32> to vector<8x128xf32>
    %12 = arith.addf %9, %11 : vector<8x128xf32>
    %13 = math.tanh %12 : vector<8x128xf32>
    %c0_11 = arith.constant 0 : index
    %c0_12 = arith.constant 0 : index
    %14 = vector.load %arg5[%c0_11, %c0_12] : memref<8x128xf32, #tpu.memory_space<vmem>>, vector<8x128xf32>
    tpu.vector_store %arg5[%c0_11, %c0_12], %13 {strides = array<i32>} : memref<8x128xf32, #tpu.memory_space<vmem>>, vector<8x128xf32>,
    return
  }
}

</mosaic_0001>

<bundles_post_ra>
// kernel: tpu_custom_call.1
= control target key start
LH: loop header
LB: loop body
LE: loop exit
PB: predicated region body
PF: predicated region fallthrough
CT: control target
= control target key end

     0   :  { %10 = vsyncpa [#allocation3], 0  ;;  %s334_s0 = inlined_call_operand.hbm [shape: f32[8,128], index: 0, kind: input, shape index: {}]   ;;  %s335_s1 = inlined_call_operand.hbm [shape: f32[128,128], index: 1, kind: input, shape index: {}]   ;;  %s336_s2 = inlined_call_operand.vmem [shape: f32[1,128], index: 2, kind: input, shape index: {}]   ;;  %s337_s3 = inlined_call_operand.hbm [shape: f32[128,128], index: 3, kind: input, shape index: {}]   ;;  %s338_s4 = inlined_call_operand.vmem [shape: f32[1,128], index: 4, kind: input, shape index: {}]   ;;  %s339_s5 = inlined_call_operand.hbm [shape: f32[8,128], index: 5, kind: output, shape index: {}]  }
   0x1   :  { %11 = vsyncpa [#allocation6], 0  ;;  %s28_s20 = sshll.u32 %s335_s1, 4  ;;  %s29_s20 = int_to_ptr.hbm [resolvable:$true] %s28_s20 }
   0x2   :  { %12 = vsyncpa [#allocation4], 0  ;;  %s280_s21 = smov [#allocation5]   ;;  %s18_s25 = sshll.u32 %s334_s0, 4  ;;  %s19_s25 = int_to_ptr.hbm [resolvable:$true] %s18_s25 }
   0x3   :  { %s30_s22 = sshll.u32 %s280_s21, 4  ;;  %s281_s26 = smov 128   ;;  %s31_s22 = int_to_ptr.vmem [resolvable:$true] %s30_s22 }
   0x4   :  { %s282_s27 = smov 8   ;;  %s283_s28 = smov [#allocation2]  }
   0x5   :  { %36 = dma.hbm_to_vmem [thread:$0]  %s29_s20, 2048, %s31_s22, [#allocation6], %s281_s26, %s281_s26, %s282_s27  }
   0x6   :  { %s20_s29 = sshll.u32 %s283_s28, 4  ;;  %s43_s7 = sshll.u32 %s337_s3, 4  ;;  %s21_s29 = int_to_ptr.vmem [resolvable:$true] %s20_s29  ;;  %s44_s7 = int_to_ptr.hbm [resolvable:$true] %s43_s7 }
   0x7   :  { %23 = dma.hbm_to_vmem [thread:$0]  %s19_s25, 128, %s21_s29, [#allocation3]  }
   0x8   :  { %s284_s1 = smov [#allocation7]  }
   0x9   :  { %s45_s8 = sshll.u32 %s284_s1, 4  ;;  %s46_s8 = int_to_ptr.vmem [resolvable:$true] %s45_s8 }
   0xa   :  { %51 = dma.hbm_to_vmem [thread:$0]  %s44_s7, 2048, %s46_s8, [#allocation6], %s281_s26, %s281_s26, %s282_s27  }
   0xb   :  { %274 = dma.done.wait [#allocation3], 128  }
   0xc   :  { %275 = vsyncadd [#allocation3], 4294967168 }
   0xd   :  { %276 = dma.done.wait [#allocation6], 4096  }
   0xe   :  { %277 = vsyncadd [#allocation6], 4294963200  ;;  %v82_v0 = vld [vmem:[#allocation5 + $0x78] sm:$0xff]  ;;  %v81_v1 = vld [vmem:[#allocation5 + $0x70] sm:$0xff]  ;;  %s285_s11 = smov [#allocation8]   ;;  %s157_s15 = sshll.u32 %s339_s5, 4  ;;  %s158_s15 = int_to_ptr.hbm [resolvable:$true] %s157_s15 }
   0xf   :  { %87 = vmatpush.msra.mxu0 %v82_v0  ;;  %v80_v2 = vld [vmem:[#allocation5 + $0x68] sm:$0xff]  ;;  %v79_v3 = vld [vmem:[#allocation5 + $0x60] sm:$0xff]  ;;  %v123_v4 = vld [vmem:[#allocation7 + $0x78] sm:$0xff]  ;;  %s155_s12 = sshll.u32 %s285_s11, 4  ;;  %s156_s12 = int_to_ptr.vmem [resolvable:$true] %s155_s12 }
  0x10   :  { %v78_v5 = vld [vmem:[#allocation5 + $0x58] sm:$0xff]  ;;  %128 = vmatpush.msra.mxu1 %v123_v4  ;;  %v122_v6 = vld [vmem:[#allocation7 + $0x70] sm:$0xff]  ;;  %v121_v7 = vld [vmem:[#allocation7 + $0x68] sm:$0xff] }
  0x11   :  { %88 = vmatpush.msra.mxu0 %v81_v1  ;;  %v77_v8 = vld [vmem:[#allocation5 + $0x50] sm:$0xff]  ;;  %v120_v9 = vld [vmem:[#allocation7 + $0x60] sm:$0xff]  ;;  %v76_v10 = vld [vmem:[#allocation5 + $0x48] sm:$0xff] }
  0x12   :  { %129 = vmatpush.msra.mxu1 %v122_v6  ;;  %v119_v11 = vld [vmem:[#allocation7 + $0x58] sm:$0xff]  ;;  %v75_v12 = vld [vmem:[#allocation5 + $0x40] sm:$0xff]  ;;  %v118_v13 = vld [vmem:[#allocation7 + $0x50] sm:$0xff] }
  0x13   :  { %89 = vmatpush.msra.mxu0 %v80_v2  ;;  %v74_v14 = vld [vmem:[#allocation5 + $0x38] sm:$0xff]  ;;  %v117_v15 = vld [vmem:[#allocation7 + $0x48] sm:$0xff]  ;;  %v73_v16 = vld [vmem:[#allocation5 + $0x30] sm:$0xff] }
  0x14   :  { %130 = vmatpush.msra.mxu1 %v121_v7  ;;  %v116_v17 = vld [vmem:[#allocation7 + $0x40] sm:$0xff]  ;;  %v72_v18 = vld [vmem:[#allocation5 + $0x28] sm:$0xff]  ;;  %v115_v19 = vld [vmem:[#allocation7 + $0x38] sm:$0xff] }
  0x15   :  { %90 = vmatpush.msra.mxu0 %v79_v3  ;;  %v71_v20 = vld [vmem:[#allocation5 + $0x20] sm:$0xff]  ;;  %v114_v21 = vld [vmem:[#allocation7 + $0x30] sm:$0xff]  ;;  %v70_v22 = vld [vmem:[#allocation5 + $0x18] sm:$0xff] }
  0x16   :  { %131 = vmatpush.msra.mxu1 %v120_v9  ;;  %v113_v23 = vld [vmem:[#allocation7 + $0x28] sm:$0xff]  ;;  %v69_v24 = vld [vmem:[#allocation5 + $0x10] sm:$0xff]  ;;  %v112_v25 = vld [vmem:[#allocation7 + $0x20] sm:$0xff] }
  0x17   :  { %91 = vmatpush.msra.mxu0 %v78_v5  ;;  %v68_v26 = vld [vmem:[#allocation5 + $0x8] sm:$0xff]  ;;  %v111_v27 = vld [vmem:[#allocation7 + $0x18] sm:$0xff]  ;;  %v67_v28 = vld [vmem:[#allocation5] sm:$0xff] }
  0x18   :  { %132 = vmatpush.msra.mxu1 %v119_v11  ;;  %v66_v29 = vld [vmem:[#allocation2] sm:$0xff]  ;;  %v110_v30 = vld [vmem:[#allocation7 + $0x10] sm:$0xff]  ;;  %v109_v31 = vld [vmem:[#allocation7 + $0x8] sm:$0xff] }
  0x19   :  { %92 = vmatpush.msra.mxu0 %v77_v8  ;;  %v108_v32 = vld [vmem:[#allocation7] sm:$0xff]  ;;  %v174_v33 = vld [vmem:[%s336_s2] ss:$0 sm:$0xff] }
  0x1a   :  { %133 = vmatpush.msra.mxu1 %v118_v13  ;;  %v175_v37 = vld [vmem:[%s338_s4] ss:$0 sm:$0xff] }
  0x1b   :  { %93 = vmatpush.msra.mxu0 %v76_v10 }
  0x1c   :  { %134 = vmatpush.msra.mxu1 %v117_v15 }
  0x1d   :  { %94 = vmatpush.msra.mxu0 %v75_v12 }
  0x1e   :  { %135 = vmatpush.msra.mxu1 %v116_v17 }
  0x1f   :  { %95 = vmatpush.msra.mxu0 %v74_v14 }
  0x20   :  { %136 = vmatpush.msra.mxu1 %v115_v19 }
  0x21   :  { %96 = vmatpush.msra.mxu0 %v73_v16 }
  0x22   :  { %137 = vmatpush.msra.mxu1 %v114_v21 }
  0x23   :  { %97 = vmatpush.msra.mxu0 %v72_v18 }
  0x24   :  { %138 = vmatpush.msra.mxu1 %v113_v23 }
  0x25   :  { %98 = vmatpush.msra.mxu0 %v71_v20 }
  0x26   :  { %139 = vmatpush.msra.mxu1 %v112_v25 }
  0x27   :  { %99 = vmatpush.msra.mxu0 %v70_v22 }
  0x28   :  { %140 = vmatpush.msra.mxu1 %v111_v27 }
  0x29   :  { %100 = vmatpush.msra.mxu0 %v69_v24 }
  0x2a   :  { %141 = vmatpush.msra.mxu1 %v110_v30 }
  0x2b   :  { %101 = vmatpush.msra.mxu0 %v68_v26 }
  0x2c   :  { %142 = vmatpush.msra.mxu1 %v109_v31 }
  0x2d   :  { %102 = vmatpush.msra.mxu0 %v67_v28 }
  0x2e   :  { %103 = vmatmul.f32.vlgmr.msra.gmra.mxu0 %v66_v29  ;;  %143 = vmatpush.msra.mxu1 %v108_v32 }
  0xab   :  { %v104_v34 = vpop.f32.mrf.mxu0 }
  0xac   :  { %v105_v35 = vadd.f32 %v174_v33, %v104_v34 }
  0xae   :  { %v107_v36 = vmax.f32 %v105_v35, 0.0 }
  0xb0   :  { %144 = vmatmul.f32.vlgmr.msra.gmra.mxu1 %v107_v36 }
 0x12d   :  { %v145_v38 = vpop.f32.mrf.mxu1 }
 0x12e   :  { %v146_v39 = vadd.f32 %v175_v37, %v145_v38 }
 0x130   :  { %176 = vtanh.f32 %v146_v39 }
 0x136   :  { %v177_v40 = vpop.eup %176 }
 0x137   :  { %149 = vst [vmem:[#allocation8] sm:$0xff] %v177_v40 }
 0x138   :  { %160 = dma.vmem_to_hbm [thread:$0]  %s156_s12, 128, %s158_s15, [#allocation4]  }
 0x139   :  { %278 = dma.done.wait [#allocation4], 128  }
 0x13a   :  { %279 = vsyncadd [#allocation4], 4294967168 }
 0x13b   :  { %165 = vsyncpa [#allocation3], 1 }
 0x13c   :  { %166 = vsyncpa [#allocation6], 1 }
 0x13d   :  { %167 = vsyncpa [#allocation4], 1 }

</bundles_post_ra>
